<compile_context>
chip_gen: v6e
topology: v6e:2x2x1
jax: 0.10.0
libtpu: 0.0.40
codegen_flags: <defaults>
</compile_context>

<pallas_src>
import jax
import jax.numpy as jnp
from jax.experimental import pallas as pl
from jax.experimental.pallas import tpu as pltpu

LANE = 128


def _round_up(x, m):
    return ((x + m - 1) // m) * m


def _pad2(x, rows, cols):
    return jnp.pad(x, ((0, rows - x.shape[0]), (0, cols - x.shape[1])))


def fusion_kernel(trans_ref, rf_ref,
                  w1_ref, b1_ref, w2_ref, b2_ref,        # trans_adjust
                  wa1_ref, ba1_ref, wa2_ref, ba2_ref,    # attention
                  wfc_t_ref, wfc_r_ref, bfc_ref,         # fc (split over the concat)
                  out_ref):
    mm_dtype = w1_ref.dtype          # matmul operand dtype (bf16 recommended)

    x = trans_ref[...]               # (TB, trans_dim) — fed to the MXU in its HBM dtype
    rf = rf_ref[...]                 # (TB, C)

    # trans_adjust: Linear -> ReLU -> (Dropout = identity) -> Linear
    # TODO(synk): train-mode dropout not implemented (eval()/inference semantics assumed).
    h = jnp.dot(x, w1_ref[...], preferred_element_type=jnp.float32) + b1_ref[...]
    h = jnp.maximum(h, 0.0)                                                        # (TB, Hp) f32
    t = jnp.dot(h.astype(mm_dtype), w2_ref[...],
                preferred_element_type=jnp.float32) + b2_ref[...]                  # (TB, Cp) f32

    # attention: Linear -> ReLU -> Linear(N=1), then sigmoid.
    a = jnp.dot(t.astype(mm_dtype), wa1_ref[...],
                preferred_element_type=jnp.float32) + ba1_ref[...]
    a = jnp.maximum(a, 0.0)                                                        # (TB, Ap) f32
    # N=1 output column: VPU multiply + XLU lane-reduce instead of a full MXU pass.
    logit = jnp.sum(a * wa2_ref[...], axis=-1, keepdims=True) + ba2_ref[...]       # (TB, 1)
    alpha = jax.nn.sigmoid(logit)                                                  # (TB, 1) f32

    # fused = cat([alpha*t, (1-alpha)*rf], dim=1); (Dropout = identity); fc(fused)
    #   == (alpha*t) @ Wfc[:C] + ((1-alpha)*rf) @ Wfc[C:] + bfc      (exact rewrite)
    fused_t = (alpha * t).astype(mm_dtype)                 # (TB, Cp)  (padded cols stay 0)
    fused_r = ((1.0 - alpha) * rf).astype(mm_dtype)        # (TB, C)
    out = (jnp.dot(fused_t, wfc_t_ref[...], preferred_element_type=jnp.float32)
           + jnp.dot(fused_r, wfc_r_ref[...], preferred_element_type=jnp.float32)
           + bfc_ref[...])                                 # (TB, C) f32
    out_ref[...] = out.astype(out_ref.dtype)


def prepare_fusion_params(p, *, param_dtype=jnp.bfloat16):
    """Pad lane dims to 128, split the fc weight over the concat and cast the matmul
    weights to `param_dtype`. Call ONCE and reuse — not once per forward."""
    trans_dim, hid = p["w1"].shape
    C = p["w2"].shape[1]
    ahid = p["wa1"].shape[1]
    Hp, Cp, Ap = _round_up(hid, LANE), _round_up(C, LANE), _round_up(ahid, LANE)
    f32 = jnp.float32

    return (
        _pad2(p["w1"], trans_dim, Hp).astype(param_dtype),      # w1    (trans_dim, Hp)
        _pad2(p["b1"], 1, Hp).astype(f32),                      # b1    (1, Hp)
        _pad2(p["w2"], Hp, Cp).astype(param_dtype),             # w2    (Hp, Cp)
        _pad2(p["b2"], 1, Cp).astype(f32),                      # b2    (1, Cp)
        _pad2(p["wa1"], Cp, Ap).astype(param_dtype),            # wa1   (Cp, Ap)
        _pad2(p["ba1"], 1, Ap).astype(f32),                     # ba1   (1, Ap)
        _pad2(p["wa2"].reshape(1, ahid), 1, Ap).astype(f32),    # wa2   (1, Ap) row vector
        p["ba2"].reshape(1, 1).astype(f32),                     # ba2   (1, 1)
        _pad2(p["wfc"][:C], Cp, C).astype(param_dtype),         # wfc_t (Cp, C)
        p["wfc"][C:].astype(param_dtype),                       # wfc_r (C, C)  (unpadded)
        p["bfc"].reshape(1, C).astype(f32),                     # bfc   (1, C)
    )


def fusion_layer(trans_out, rf_prob, prepared, *, tb=1024, out_dtype=None):
    """Forward pass of FusionLayer.

    trans_out (B, trans_dim) and rf_prob (B, C): bf16 recommended (the kernel is
    HBM-bound, so bf16 I/O roughly halves wall time). `prepared` comes from
    prepare_fusion_params(). Output is (B, C) in `out_dtype` (default: input dtype).
    """
    B, trans_dim = trans_out.shape
    C = rf_prob.shape[-1]
    if out_dtype is None:
        out_dtype = trans_out.dtype

    # Batch tile: multiples of 8 sublanes, never larger than the (rounded) batch.
    TB = max(8, min(_round_up(tb, 8), _round_up(B, 8)))
    n_steps = pl.cdiv(B, TB)
    if n_steps == 1 and B >= 1024:
        # v7x megacore: keep >= 2 grid steps so both TensorCores get work.
        TB = _round_up(pl.cdiv(B, 2), 8)
        n_steps = pl.cdiv(B, TB)

    weights = tuple(prepared)

    def act_spec(cols):
        return pl.BlockSpec((TB, cols), lambda i: (i, 0))

    def resident_spec(arr):
        # Constant block index -> the weight stays VMEM-resident across grid steps.
        return pl.BlockSpec(arr.shape, lambda i: (0, 0))

    in_specs = [act_spec(trans_dim), act_spec(C)] + [resident_spec(w) for w in weights]

    # Scoped-VMEM estimate: only raise the limit when the double-buffered activation
    # tiles would exceed the strictest (v5e, 16 MiB) default budget.
    out_isize = jnp.dtype(out_dtype).itemsize
    vmem_est = (2 * TB * (trans_dim * trans_out.dtype.itemsize
                          + C * rf_prob.dtype.itemsize
                          + C * out_isize)
                + sum(int(w.size) * w.dtype.itemsize for w in weights)
                + 8 * TB * LANE * 4)                       # headroom for f32 intermediates
    vmem_limit = int(min(2 * vmem_est, 100 << 20)) if vmem_est > (14 << 20) else None

    return pl.pallas_call(
        fusion_kernel,
        out_shape=jax.ShapeDtypeStruct((B, C), out_dtype),
        grid=(n_steps,),
        in_specs=in_specs,
        out_specs=pl.BlockSpec((TB, C), lambda i: (i, 0)),
        compiler_params=pltpu.CompilerParams(
            # Batch tiles are independent -> shard across TensorCores on v7x megacore.
            dimension_semantics=("parallel",),
            vmem_limit_bytes=vmem_limit,
        ),
    )(trans_out, rf_prob, *weights)


def init_params(key, trans_dim, num_classes):
    """Deterministic synthetic init. Weights stored as (in, out); biases as (1, out)."""
    hid = trans_dim // 2
    ahid = num_classes // 2
    ks = jax.random.split(key, 10)

    def lin(kw, fan_in, fan_out):
        scale = 1.0 / jnp.sqrt(fan_in)
        return jax.random.uniform(kw, (fan_in, fan_out), jnp.float32, -scale, scale)

    return {
        "w1": lin(ks[0], trans_dim, hid),
        "b1": jax.random.uniform(ks[1], (1, hid), jnp.float32, -0.1, 0.1),
        "w2": lin(ks[2], hid, num_classes),
        "b2": jax.random.uniform(ks[3], (1, num_classes), jnp.float32, -0.1, 0.1),
        "wa1": lin(ks[4], num_classes, ahid),
        "ba1": jax.random.uniform(ks[5], (1, ahid), jnp.float32, -0.1, 0.1),
        "wa2": lin(ks[6], ahid, 1),
        "ba2": jax.random.uniform(ks[7], (1, 1), jnp.float32, -0.1, 0.1),
        "wfc": lin(ks[8], 2 * num_classes, num_classes),     # fc over the concat (2C, C)
        "bfc": jax.random.uniform(ks[9], (1, num_classes), jnp.float32, -0.1, 0.1),
    }


def fusion_layer_ref(trans_out, rf_prob, p):
    """Pure-JAX f32 reference (eval-mode dropout)."""
    x = trans_out.astype(jnp.float32)
    rf = rf_prob.astype(jnp.float32)
    h = jnp.maximum(x @ p["w1"] + p["b1"], 0.0)
    t = h @ p["w2"] + p["b2"]
    a = jnp.maximum(t @ p["wa1"] + p["ba1"], 0.0)
    alpha = jax.nn.sigmoid(a @ p["wa2"] + p["ba2"])
    fused = jnp.concatenate([alpha * t, (1.0 - alpha) * rf], axis=1)
    return fused @ p["wfc"] + p["bfc"]


if __name__ == "__main__":
    trans_dim, num_classes = 32, 8
    key = jax.random.PRNGKey(0)
    k_p, k_t1, k_r1, k_t2, k_r2 = jax.random.split(key, 5)
    params = init_params(k_p, trans_dim, num_classes)

    # Case 1: f32 weights + f32 I/O, single grid step -> exact check of the padding,
    # fc-split and BlockSpec plumbing against the pure-JAX reference.
    B1 = 8
    t1 = jax.random.normal(k_t1, (B1, trans_dim), jnp.float32)
    r1 = jax.nn.softmax(jax.random.normal(k_r1, (B1, num_classes), jnp.float32), axis=-1)
    prep_f32 = prepare_fusion_params(params, param_dtype=jnp.float32)
    out1 = jax.block_until_ready(fusion_layer(t1, r1, prep_f32))
    ref1 = fusion_layer_ref(t1, r1, params)
    assert out1.shape == (B1, num_classes)
    assert jnp.allclose(out1, ref1, atol=1e-5, rtol=1e-5), "mismatch vs reference (f32 path)"

    # Case 2: recommended production config — bf16 I/O + bf16 matmul weights, batch not
    # divisible by the tile (ragged final grid block, no wrapper-side padding).
    B2 = 50
    t2 = jax.random.normal(k_t2, (B2, trans_dim), jnp.float32).astype(jnp.bfloat16)
    r2 = jax.nn.softmax(jax.random.normal(k_r2, (B2, num_classes), jnp.float32),
                        axis=-1).astype(jnp.bfloat16)
    prep_bf16 = prepare_fusion_params(params, param_dtype=jnp.bfloat16)
    out2 = jax.block_until_ready(fusion_layer(t2, r2, prep_bf16, tb=16))
    ref2 = fusion_layer_ref(t2, r2, params)
    assert out2.shape == (B2, num_classes)
    assert out2.dtype == jnp.bfloat16
    assert jnp.allclose(out2.astype(jnp.float32), ref2, atol=5e-2, rtol=5e-2), \
        "mismatch vs reference (bf16 path)"

    print("KERNEL_OK")
</pallas_src>

<mosaic_0001>
module attributes {stable_mosaic.version = 11 : i64} {
  func.func @fusion_kernel(%arg0: i32, %arg1: memref<8x32xf32, #tpu.memory_space<vmem>>, %arg2: memref<8x8xf32, #tpu.memory_space<vmem>>, %arg3: memref<32x128xf32, #tpu.memory_space<vmem>>, %arg4: memref<1x128xf32, #tpu.memory_space<vmem>>, %arg5: memref<128x128xf32, #tpu.memory_space<vmem>>, %arg6: memref<1x128xf32, #tpu.memory_space<vmem>>, %arg7: memref<128x128xf32, #tpu.memory_space<vmem>>, %arg8: memref<1x128xf32, #tpu.memory_space<vmem>>, %arg9: memref<1x128xf32, #tpu.memory_space<vmem>>, %arg10: memref<1x1xf32, #tpu.memory_space<vmem>>, %arg11: memref<128x8xf32, #tpu.memory_space<vmem>>, %arg12: memref<8x8xf32, #tpu.memory_space<vmem>>, %arg13: memref<1x8xf32, #tpu.memory_space<vmem>>, %arg14: memref<8x8xf32, #tpu.memory_space<vmem>>) attributes {dimension_semantics = [#tpu.dimension_semantics<parallel>], iteration_bounds = array<i64: 1>, scalar_prefetch = 0 : i64, scratch_operands = 0 : i64, tpu.core_type = #tpu.core_type<tc>, window_params = [{transform_indices = @transform_0, window_bounds = array<i64: 8, 32>}, {transform_indices = @transform_1, window_bounds = array<i64: 8, 8>}, {pipeline_mode = #tpu.pipeline_mode<synchronous>, transform_indices = @transform_2, window_bounds = array<i64: 32, 128>}, {pipeline_mode = #tpu.pipeline_mode<synchronous>, transform_indices = @transform_3, window_bounds = array<i64: 1, 128>}, {pipeline_mode = #tpu.pipeline_mode<synchronous>, transform_indices = @transform_4, window_bounds = array<i64: 128, 128>}, {pipeline_mode = #tpu.pipeline_mode<synchronous>, transform_indices = @transform_5, window_bounds = array<i64: 1, 128>}, {pipeline_mode = #tpu.pipeline_mode<synchronous>, transform_indices = @transform_6, window_bounds = array<i64: 128, 128>}, {pipeline_mode = #tpu.pipeline_mode<synchronous>, transform_indices = @transform_7, window_bounds = array<i64: 1, 128>}, {pipeline_mode = #tpu.pipeline_mode<synchronous>, transform_indices = @transform_8, window_bounds = array<i64: 1, 128>}, {pipeline_mode = #tpu.pipeline_mode<synchronous>, transform_indices = @transform_9, window_bounds = array<i64: 1, 1>}, {pipeline_mode = #tpu.pipeline_mode<synchronous>, transform_indices = @transform_10, window_bounds = array<i64: 128, 8>}, {pipeline_mode = #tpu.pipeline_mode<synchronous>, transform_indices = @transform_11, window_bounds = array<i64: 8, 8>}, {pipeline_mode = #tpu.pipeline_mode<synchronous>, transform_indices = @transform_12, window_bounds = array<i64: 1, 8>}, {transform_indices = @transform_13, window_bounds = array<i64: 8, 8>}]} {
    %c0 = arith.constant 0 : index
    %c0_0 = arith.constant 0 : index
    %0 = vector.load %arg1[%c0, %c0_0] : memref<8x32xf32, #tpu.memory_space<vmem>>, vector<8x32xf32>
    %c0_1 = arith.constant 0 : index
    %c0_2 = arith.constant 0 : index
    %1 = vector.load %arg2[%c0_1, %c0_2] : memref<8x8xf32, #tpu.memory_space<vmem>>, vector<8x8xf32>
    %c0_3 = arith.constant 0 : index
    %c0_4 = arith.constant 0 : index
    %2 = vector.load %arg3[%c0_3, %c0_4] : memref<32x128xf32, #tpu.memory_space<vmem>>, vector<32x128xf32>
    %cst = arith.constant dense<0.000000e+00> : vector<8x128xf32>
    %3 = tpu.matmul %0, %2, %cst {dimension_numbers = #tpu.dot_dimension_numbers<[1], [0], [0], [1], [0, 0, 1, 1], [], []>} : vector<8x32xf32>, vector<32x128xf32>, vector<8x128xf32> -> vector<8x128xf32>
    %c0_5 = arith.constant 0 : index
    %c0_6 = arith.constant 0 : index
    %4 = vector.load %arg4[%c0_5, %c0_6] : memref<1x128xf32, #tpu.memory_space<vmem>>, vector<1x128xf32>
    %5 = vector.broadcast %4 : vector<1x128xf32> to vector<8x128xf32>
    %6 = arith.addf %3, %5 : vector<8x128xf32>
    %cst_7 = arith.constant 0.000000e+00 : f32
    %7 = vector.broadcast %cst_7 : f32 to vector<8x128xf32>
    %8 = arith.maximumf %6, %7 : vector<8x128xf32>
    %c0_8 = arith.constant 0 : index
    %c0_9 = arith.constant 0 : index
    %9 = vector.load %arg5[%c0_8, %c0_9] : memref<128x128xf32, #tpu.memory_space<vmem>>, vector<128x128xf32>
    %cst_10 = arith.constant dense<0.000000e+00> : vector<8x128xf32>
    %10 = tpu.matmul %8, %9, %cst_10 {dimension_numbers = #tpu.dot_dimension_numbers<[1], [0], [0], [1], [0, 0, 1, 1], [], []>} : vector<8x128xf32>, vector<128x128xf32>, vector<8x128xf32> -> vector<8x128xf32>
    %c0_11 = arith.constant 0 : index
    %c0_12 = arith.constant 0 : index
    %11 = vector.load %arg6[%c0_11, %c0_12] : memref<1x128xf32, #tpu.memory_space<vmem>>, vector<1x128xf32>
    %12 = vector.broadcast %11 : vector<1x128xf32> to vector<8x128xf32>
    %13 = arith.addf %10, %12 : vector<8x128xf32>
    %c0_13 = arith.constant 0 : index
    %c0_14 = arith.constant 0 : index
    %14 = vector.load %arg7[%c0_13, %c0_14] : memref<128x128xf32, #tpu.memory_space<vmem>>, vector<128x128xf32>
    %cst_15 = arith.constant dense<0.000000e+00> : vector<8x128xf32>
    %15 = tpu.matmul %13, %14, %cst_15 {dimension_numbers = #tpu.dot_dimension_numbers<[1], [0], [0], [1], [0, 0, 1, 1], [], []>} : vector<8x128xf32>, vector<128x128xf32>, vector<8x128xf32> -> vector<8x128xf32>
    %c0_16 = arith.constant 0 : index
    %c0_17 = arith.constant 0 : index
    %16 = vector.load %arg8[%c0_16, %c0_17] : memref<1x128xf32, #tpu.memory_space<vmem>>, vector<1x128xf32>
    %17 = vector.broadcast %16 : vector<1x128xf32> to vector<8x128xf32>
    %18 = arith.addf %15, %17 : vector<8x128xf32>
    %cst_18 = arith.constant 0.000000e+00 : f32
    %19 = vector.broadcast %cst_18 : f32 to vector<8x128xf32>
    %20 = arith.maximumf %18, %19 : vector<8x128xf32>
    %c0_19 = arith.constant 0 : index
    %c0_20 = arith.constant 0 : index
    %21 = vector.load %arg9[%c0_19, %c0_20] : memref<1x128xf32, #tpu.memory_space<vmem>>, vector<1x128xf32>
    %22 = vector.broadcast %21 : vector<1x128xf32> to vector<8x128xf32>
    %23 = arith.mulf %20, %22 : vector<8x128xf32>
    %cst_21 = arith.constant dense<0.000000e+00> : vector<8xf32>
    %24 = vector.multi_reduction <add>, %23, %cst_21 [1] : vector<8x128xf32> to vector<8xf32>
    %25 = vector.shape_cast %24 : vector<8xf32> to vector<8x1xf32>
    %c0_22 = arith.constant 0 : index
    %c0_23 = arith.constant 0 : index
    %26 = vector.load %arg10[%c0_22, %c0_23] : memref<1x1xf32, #tpu.memory_space<vmem>>, vector<1x1xf32>
    %27 = vector.broadcast %26 : vector<1x1xf32> to vector<8x1xf32>
    %28 = arith.addf %25, %27 : vector<8x1xf32>
    %29 = arith.negf %28 : vector<8x1xf32>
    %30 = math.exp %29 : vector<8x1xf32>
    %cst_24 = arith.constant 1.000000e+00 : f32
    %31 = vector.broadcast %cst_24 : f32 to vector<8x1xf32>
    %32 = arith.addf %31, %30 : vector<8x1xf32>
    %33 = arith.divf %31, %32 : vector<8x1xf32>
    %34 = vector.broadcast %33 : vector<8x1xf32> to vector<8x128xf32>
    %35 = arith.mulf %34, %13 : vector<8x128xf32>
    %cst_25 = arith.constant 1.000000e+00 : f32
    %36 = vector.broadcast %cst_25 : f32 to vector<8x1xf32>
    %37 = arith.subf %36, %33 : vector<8x1xf32>
    %38 = vector.broadcast %37 : vector<8x1xf32> to vector<8x8xf32>
    %39 = arith.mulf %38, %1 : vector<8x8xf32>
    %c0_26 = arith.constant 0 : index
    %c0_27 = arith.constant 0 : index
    %40 = vector.load %arg11[%c0_26, %c0_27] : memref<128x8xf32, #tpu.memory_space<vmem>>, vector<128x8xf32>
    %cst_28 = arith.constant dense<0.000000e+00> : vector<8x8xf32>
    %41 = tpu.matmul %35, %40, %cst_28 {dimension_numbers = #tpu.dot_dimension_numbers<[1], [0], [0], [1], [0, 0, 1, 1], [], []>} : vector<8x128xf32>, vector<128x8xf32>, vector<8x8xf32> -> vector<8x8xf32>
    %c0_29 = arith.constant 0 : index
    %c0_30 = arith.constant 0 : index
    %42 = vector.load %arg12[%c0_29, %c0_30] : memref<8x8xf32, #tpu.memory_space<vmem>>, vector<8x8xf32>
    %cst_31 = arith.constant dense<0.000000e+00> : vector<8x8xf32>
    %43 = tpu.matmul %39, %42, %cst_31 {dimension_numbers = #tpu.dot_dimension_numbers<[1], [0], [0], [1], [0, 0, 1, 1], [], []>} : vector<8x8xf32>, vector<8x8xf32>, vector<8x8xf32> -> vector<8x8xf32>
    %44 = arith.addf %41, %43 : vector<8x8xf32>
    %c0_32 = arith.constant 0 : index
    %c0_33 = arith.constant 0 : index
    %45 = vector.load %arg13[%c0_32, %c0_33] : memref<1x8xf32, #tpu.memory_space<vmem>>, vector<1x8xf32>
    %46 = vector.broadcast %45 : vector<1x8xf32> to vector<8x8xf32>
    %47 = arith.addf %44, %46 : vector<8x8xf32>
    %c0_34 = arith.constant 0 : index
    %c0_35 = arith.constant 0 : index
    %48 = vector.load %arg14[%c0_34, %c0_35] : memref<8x8xf32, #tpu.memory_space<vmem>>, vector<8x8xf32>
    tpu.vector_store %arg14[%c0_34, %c0_35], %47 {strides = array<i32>} : memref<8x8xf32, #tpu.memory_space<vmem>>, vector<8x8xf32>,
    return
  }
  func.func @transform_0(%arg0: i32) -> (i32, i32) {
    %c0_i32 = arith.constant 0 : i32
    %c0_i32_0 = arith.constant 0 : i32
    return %arg0, %c0_i32 : i32, i32
  }
  func.func @transform_1(%arg0: i32) -> (i32, i32) {
    %c0_i32 = arith.constant 0 : i32
    %c0_i32_0 = arith.constant 0 : i32
    return %arg0, %c0_i32 : i32, i32
  }
  func.func @transform_2(%arg0: i32) -> (i32, i32) {
    %c0_i32 = arith.constant 0 : i32
    %c0_i32_0 = arith.constant 0 : i32
    %c0_i32_1 = arith.constant 0 : i32
    return %c0_i32, %c0_i32_0 : i32, i32
  }
  func.func @transform_3(%arg0: i32) -> (i32, i32) {
    %c0_i32 = arith.constant 0 : i32
    %c0_i32_0 = arith.constant 0 : i32
    %c0_i32_1 = arith.constant 0 : i32
    return %c0_i32, %c0_i32_0 : i32, i32
  }
  func.func @transform_4(%arg0: i32) -> (i32, i32) {
    %c0_i32 = arith.constant 0 : i32
    %c0_i32_0 = arith.constant 0 : i32
    %c0_i32_1 = arith.constant 0 : i32
    return %c0_i32, %c0_i32_0 : i32, i32
  }
  func.func @transform_5(%arg0: i32) -> (i32, i32) {
    %c0_i32 = arith.constant 0 : i32
    %c0_i32_0 = arith.constant 0 : i32
    %c0_i32_1 = arith.constant 0 : i32
    return %c0_i32, %c0_i32_0 : i32, i32
  }
  func.func @transform_6(%arg0: i32) -> (i32, i32) {
    %c0_i32 = arith.constant 0 : i32
    %c0_i32_0 = arith.constant 0 : i32
    %c0_i32_1 = arith.constant 0 : i32
    return %c0_i32, %c0_i32_0 : i32, i32
  }
  func.func @transform_7(%arg0: i32) -> (i32, i32) {
    %c0_i32 = arith.constant 0 : i32
    %c0_i32_0 = arith.constant 0 : i32
    %c0_i32_1 = arith.constant 0 : i32
    return %c0_i32, %c0_i32_0 : i32, i32
  }
  func.func @transform_8(%arg0: i32) -> (i32, i32) {
    %c0_i32 = arith.constant 0 : i32
    %c0_i32_0 = arith.constant 0 : i32
    %c0_i32_1 = arith.constant 0 : i32
    return %c0_i32, %c0_i32_0 : i32, i32
  }
  func.func @transform_9(%arg0: i32) -> (i32, i32) {
    %c0_i32 = arith.constant 0 : i32
    %c0_i32_0 = arith.constant 0 : i32
    %c0_i32_1 = arith.constant 0 : i32
    return %c0_i32, %c0_i32_0 : i32, i32
  }
  func.func @transform_10(%arg0: i32) -> (i32, i32) {
    %c0_i32 = arith.constant 0 : i32
    %c0_i32_0 = arith.constant 0 : i32
    %c0_i32_1 = arith.constant 0 : i32
    return %c0_i32, %c0_i32_0 : i32, i32
  }
  func.func @transform_11(%arg0: i32) -> (i32, i32) {
    %c0_i32 = arith.constant 0 : i32
    %c0_i32_0 = arith.constant 0 : i32
    %c0_i32_1 = arith.constant 0 : i32
    return %c0_i32, %c0_i32_0 : i32, i32
  }
  func.func @transform_12(%arg0: i32) -> (i32, i32) {
    %c0_i32 = arith.constant 0 : i32
    %c0_i32_0 = arith.constant 0 : i32
    %c0_i32_1 = arith.constant 0 : i32
    return %c0_i32, %c0_i32_0 : i32, i32
  }
  func.func @transform_13(%arg0: i32) -> (i32, i32) {
    %c0_i32 = arith.constant 0 : i32
    %c0_i32_0 = arith.constant 0 : i32
    return %arg0, %c0_i32 : i32, i32
  }
}

</mosaic_0001>

<bundles_post_ra>
// kernel: tpu_custom_call.1
= control target key start
LH: loop header
LB: loop body
LE: loop exit
PB: predicated region body
PF: predicated region fallthrough
CT: control target
= control target key end

     0   :  { %s1291_s0 = inlined_call_operand.vmem [shape: f32[8,32], index: 0, kind: input, shape index: {}]   ;;  %s1292_s1 = inlined_call_operand.vmem [shape: f32[8,8], index: 1, kind: input, shape index: {}]   ;;  %s1293_s2 = inlined_call_operand.hbm [shape: f32[32,128], index: 2, kind: input, shape index: {}]   ;;  %s1294_s3 = inlined_call_operand.hbm [shape: f32[1,128], index: 3, kind: input, shape index: {}]   ;;  %s1295_s4 = inlined_call_operand.vmem [shape: f32[128,128], index: 4, kind: input, shape index: {}]   ;;  %s1296_s5 = inlined_call_operand.hbm [shape: f32[1,128], index: 5, kind: input, shape index: {}]   ;;  %s1297_s6 = inlined_call_operand.hbm [shape: f32[128,128], index: 6, kind: input, shape index: {}]   ;;  %s1298_s7 = inlined_call_operand.hbm [shape: f32[1,128], index: 7, kind: input, shape index: {}]   ;;  %s1299_s8 = inlined_call_operand.hbm [shape: f32[1,128], index: 8, kind: input, shape index: {}]   ;;  %s1300_s9 = inlined_call_operand.<no memory space> [shape: f32[1,1], index: 9, kind: input, shape index: {}]   ;;  %s1301_s10 = inlined_call_operand.vmem [shape: f32[128,8], index: 10, kind: input, shape index: {}]   ;;  %s1302_s11 = inlined_call_operand.hbm [shape: f32[8,8], index: 11, kind: input, shape index: {}]   ;;  %s1303_s12 = inlined_call_operand.vmem [shape: f32[1,8], index: 12, kind: input, shape index: {}]   ;;  %s1304_s13 = inlined_call_operand.hbm [shape: f32[8,8], index: 13, kind: output, shape index: {}]  }
   0x1   :  { %v18_v0 = vstv %s1300_s9 }
   0x2   :  { %19 = vst [vmem:[#allocation2] sm:$0x1] %v18_v0 }
   0x3   :  { %20 = vsyncpa [#allocation4], 0 }
   0x4   :  { %21 = vsyncpa [#allocation7], 0 }
   0x5   :  { %22 = vsyncpa [#allocation10], 0 }
   0x6   :  { %23 = vsyncpa [#allocation13], 0 }
   0x7   :  { %24 = vsyncpa [#allocation5], 0  ;;  %s1009_s27 = smov [#allocation6]  }
   0x8   :  { %s47_s28 = sshll.u32 %s1009_s27, 4  ;;  %s48_s28 = int_to_ptr.vmem [resolvable:$true] %s47_s28 }
   0x9   :  { %s847_s29 = scalar_lea.vmem %s48_s28, 16  ;;  %s851_s30 = scalar_lea.vmem %s48_s28, 32 }
   0xa   :  { %p848_p0 = scmp.ne.s32.totalorder %s48_s28, %s847_s29  ;;  %p852_p1 = scmp.lt.s32.totalorder %s48_s28, %s48_s28 }
   0xb   :  { %p853_p2 = scmp.lt.s32.totalorder %s851_s30, %s847_s29 }
   0xd   :  { %p854_p3 = por %p853_p2, %p852_p1 }
   0xf   :  { %p855_p4 = pnand %p854_p3, %p848_p0 }
  0x11   :  { %858 = shalt.err (!%p855_p4)
}
  0x12   :  { %50 = dma.hbm_to_vmem [thread:$0]  %s1294_s3, 16, %s48_s28, [#allocation7]  }
  0x13   :  { %s1010_s9 = smov [#allocation9]   ;;  %s1011_s17 = smov [#allocation12]  }
  0x14   :  { %s68_s16 = sshll.u32 %s1010_s9, 4  ;;  %s91_s18 = sshll.u32 %s1011_s17, 4  ;;  %s69_s16 = int_to_ptr.vmem [resolvable:$true] %s68_s16  ;;  %s92_s18 = int_to_ptr.vmem [resolvable:$true] %s91_s18 }
  0x15   :  { %s867_s19 = scalar_lea.vmem %s69_s16, 2048  ;;  %p872_p6 = scmp.lt.s32.totalorder %s69_s16, %s69_s16 }
  0x16   :  { %p868_p5 = scmp.ne.s32.totalorder %s69_s16, %s867_s19  ;;  %p873_p7 = scmp.lt.s32.totalorder %s867_s19, %s867_s19 }
  0x18   :  { %p874_p8 = por %p873_p7, %p872_p6 }
  0x1a   :  { %p875_p9 = pnand %p874_p8, %p868_p5 }
  0x1c   :  { %878 = shalt.err (!%p875_p9)
}
  0x1d   :  { %s1012_s20 = smov 128   ;;  %s1013_s21 = smov 8  }
  0x1e   :  { %74 = dma.hbm_to_vmem [thread:$0]  %s1297_s6, 2048, %s69_s16, [#allocation10], %s1012_s20, %s1012_s20, %s1013_s21  }
  0x1f   :  { %s887_s3 = scalar_lea.vmem %s92_s18, 16  ;;  %s891_s24 = scalar_lea.vmem %s92_s18, 32 }
  0x20   :  { %p888_p10 = scmp.ne.s32.totalorder %s92_s18, %s887_s3  ;;  %p892_p11 = scmp.lt.s32.totalorder %s92_s18, %s92_s18 }
  0x21   :  { %p893_p12 = scmp.lt.s32.totalorder %s891_s24, %s887_s3 }
  0x23   :  { %p894_p13 = por %p893_p12, %p892_p11 }
  0x25   :  { %p895_p0 = pnand %p894_p13, %p888_p10 }
  0x27   :  { %898 = shalt.err (!%p895_p0)
}
  0x28   :  { %94 = dma.hbm_to_vmem [thread:$0]  %s1299_s8, 16, %s92_s18, [#allocation13]  }
  0x29   :  { %s1014_s27 = smov [#allocation3]   ;;  %s1015_s29 = smov [#allocation8]  }
  0x2a   :  { %s34_s28 = sshll.u32 %s1014_s27, 4  ;;  %s59_s30 = sshll.u32 %s1015_s29, 4  ;;  %s35_s28 = int_to_ptr.vmem [resolvable:$true] %s34_s28  ;;  %s60_s30 = int_to_ptr.vmem [resolvable:$true] %s59_s30 }
  0x2b   :  { %s907_s14 = scalar_lea.vmem %s35_s28, 512  ;;  %p912_p2 = scmp.lt.s32.totalorder %s35_s28, %s35_s28 }
  0x2c   :  { %p908_p1 = scmp.ne.s32.totalorder %s35_s28, %s907_s14  ;;  %p913_p3 = scmp.lt.s32.totalorder %s907_s14, %s907_s14 }
  0x2e   :  { %p914_p4 = por %p913_p3, %p912_p2 }
  0x30   :  { %p915_p5 = pnand %p914_p4, %p908_p1 }
  0x32   :  { %918 = shalt.err (!%p915_p5)
}
  0x33   :  { %40 = dma.hbm_to_vmem [thread:$0]  %s1293_s2, 512, %s35_s28, [#allocation4], %s1012_s20, %s1012_s20, %s1013_s21  }
  0x34   :  { %s927_s9 = scalar_lea.vmem %s60_s30, 16  ;;  %s931_s8 = scalar_lea.vmem %s60_s30, 32 }
  0x35   :  { %p928_p6 = scmp.ne.s32.totalorder %s60_s30, %s927_s9  ;;  %p932_p7 = scmp.lt.s32.totalorder %s60_s30, %s60_s30 }
  0x36   :  { %p933_p8 = scmp.lt.s32.totalorder %s931_s8, %s927_s9 }
  0x38   :  { %p934_p9 = por %p933_p8, %p932_p7 }
  0x3a   :  { %p935_p10 = pnand %p934_p9, %p928_p6 }
  0x3c   :  { %938 = shalt.err (!%p935_p10)
}
  0x3d   :  { %62 = dma.hbm_to_vmem [thread:$0]  %s1296_s5, 16, %s60_s30, [#allocation7]  }
  0x3e   :  { %s1016_s18 = smov [#allocation11]   ;;  %s1017_s22 = smov [#allocation14]  }
  0x3f   :  { %s81_s19 = sshll.u32 %s1016_s18, 4  ;;  %s105_s23 = sshll.u32 %s1017_s22, 4  ;;  %s82_s19 = int_to_ptr.vmem [resolvable:$true] %s81_s19  ;;  %s106_s23 = int_to_ptr.vmem [resolvable:$true] %s105_s23 }
  0x40   :  { %s947_s3 = scalar_lea.vmem %s82_s19, 16  ;;  %s951_s2 = scalar_lea.vmem %s82_s19, 32 }
  0x41   :  { %p948_p11 = scmp.ne.s32.totalorder %s82_s19, %s947_s3  ;;  %p952_p12 = scmp.lt.s32.totalorder %s82_s19, %s82_s19 }
  0x42   :  { %p953_p13 = scmp.lt.s32.totalorder %s951_s2, %s947_s3 }
  0x44   :  { %p954_p0 = por %p953_p13, %p952_p12 }
  0x46   :  { %p955_p1 = pnand %p954_p0, %p948_p11 }
  0x48   :  { %958 = shalt.err (!%p955_p1)
}
  0x49   :  { %84 = dma.hbm_to_vmem [thread:$0]  %s1298_s7, 16, %s82_s19, [#allocation10]  }
  0x4a   :  { %s967_s24 = scalar_lea.vmem %s106_s23, 128  ;;  %p972_p3 = scmp.lt.s32.totalorder %s106_s23, %s106_s23 }
  0x4b   :  { %p968_p2 = scmp.ne.s32.totalorder %s106_s23, %s967_s24  ;;  %p973_p4 = scmp.lt.s32.totalorder %s967_s24, %s967_s24 }
  0x4d   :  { %p974_p5 = por %p973_p4, %p972_p3 }
  0x4f   :  { %p975_p6 = pnand %p974_p5, %p968_p2 }
  0x51   :  { %978 = shalt.err (!%p975_p6)
}
  0x52   :  { %108 = dma.hbm_to_vmem [thread:$0]  %s1302_s11, 128, %s106_s23, [#allocation13]  }
  0x53   :  { %999 = dma.done.wait [#allocation4], 512  }
  0x54   :  { %1000 = vsyncadd [#allocation4], 4294966784 }
  0x55   :  { %1001 = dma.done.wait [#allocation7], 32  }
  0x56   :  { %1002 = vsyncadd [#allocation7], 4294967264 }
  0x57   :  { %1003 = dma.done.wait [#allocation10], 2064  }
  0x58   :  { %1004 = vsyncadd [#allocation10], 4294965232 }
  0x59   :  { %1005 = dma.done.wait [#allocation13], 144  }
  0x5a   :  { %1006 = vsyncadd [#allocation13], 4294967152  ;;  %v1018_v1 = vmov 0.0   ;;  %vm1019_vm0 = vmmov 0   ;;  %v137_v2 = vld [vmem:[#allocation3 + $0x18] sm:$0xff]  ;;  %v136_v3 = vld [vmem:[#allocation3 + $0x10] sm:$0xff] }
  0x5b   :  { %699 = vmatprep.subr.mxu0 %v1018_v1  ;;  %707 = vmatprep.mubr.msk.f32.mxu0 %vm1019_vm0, %v1018_v1  ;;  %v235_v4 = vld [vmem:[%s1295_s4 + $0x78] sm:$0xff]  ;;  %v135_v5 = vld [vmem:[#allocation3 + $0x8] sm:$0xff]  ;;  %v134_v8 = vld [vmem:[#allocation3] sm:$0xff]  ;;  %vm145_vm1 = vcmask 261120   ;;  %v1020_v55 = vmov 0   ;;  %vm461_vm2 = vcmask 64512  }
  0x5c   :  { %710 = vmatprep.subr.mxu1 %v1018_v1  ;;  %742 = vmatprep.mubr.msk.f32.mxu1 %vm1019_vm0, %v1018_v1  ;;  %v234_v6 = vld [vmem:[%s1295_s4 + $0x70] sm:$0xff]  ;;  %v233_v7 = vld [vmem:[%s1295_s4 + $0x68] sm:$0xff]  ;;  %v132_v9 = vld [vmem:[%s1291_s0] sm:$0xff]  ;;  %s1021_s18 = smov [#allocation15]  }
  0x5d   :  { %700 = vmatpush3.msra.mxu0 %v137_v2  ;;  %711 = vmatpush3.msra.mxu1 %v235_v4  ;;  %v232_v10 = vld [vmem:[%s1295_s4 + $0x60] sm:$0xff]  ;;  %v231_v11 = vld [vmem:[%s1295_s4 + $0x58] sm:$0xff]  ;;  %v230_v12 = vld [vmem:[%s1295_s4 + $0x50] sm:$0xff]  ;;  %s620_s19 = sshll.u32 %s1021_s18, 4  ;;  %s621_s19 = int_to_ptr.vmem [resolvable:$true] %s620_s19 }
  0x5e   :  { %701 = vmatprep.subr.mxu0 %v1018_v1  ;;  %712 = vmatprep.subr.mxu1 %v1018_v1  ;;  %v229_v13 = vld [vmem:[%s1295_s4 + $0x48] sm:$0xff]  ;;  %v228_v14 = vld [vmem:[%s1295_s4 + $0x40] sm:$0xff]  ;;  %v227_v15 = vld [vmem:[%s1295_s4 + $0x38] sm:$0xff]  ;;  %p984_p8 = scmp.lt.s32.totalorder %s621_s19, %s621_s19 }
  0x5f   :  { %702 = vmatpush3.msra.mxu0 %v136_v3  ;;  %713 = vmatpush3.msra.mxu1 %v234_v6  ;;  %v226_v16 = vld [vmem:[%s1295_s4 + $0x30] sm:$0xff]  ;;  %v225_v17 = vld [vmem:[%s1295_s4 + $0x28] sm:$0xff]  ;;  %v224_v18 = vld [vmem:[%s1295_s4 + $0x20] sm:$0xff] }
  0x60   :  { %703 = vmatprep.subr.mxu0 %v1018_v1  ;;  %714 = vmatprep.subr.mxu1 %v1018_v1  ;;  %v223_v19 = vld [vmem:[%s1295_s4 + $0x18] sm:$0xff]  ;;  %v222_v20 = vld [vmem:[%s1295_s4 + $0x10] sm:$0xff]  ;;  %v221_v21 = vld [vmem:[%s1295_s4 + $0x8] sm:$0xff] }
  0x61   :  { %704 = vmatpush3.msra.mxu0 %v135_v5  ;;  %715 = vmatpush3.msra.mxu1 %v233_v7  ;;  %v220_v22 = vld [vmem:[%s1295_s4] sm:$0xff]  ;;  %v327_v24 = vld [vmem:[#allocation9 + $0x70] sm:$0xff]  ;;  %v326_v25 = vld [vmem:[#allocation9 + $0x68] sm:$0xff] }
  0x62   :  { %705 = vmatprep.subr.mxu0 %v1018_v1  ;;  %716 = vmatprep.subr.mxu1 %v1018_v1  ;;  %v328_v23 = vld [vmem:[#allocation9 + $0x78] sm:$0xff]  ;;  %v325_v26 = vld [vmem:[#allocation9 + $0x60] sm:$0xff]  ;;  %v323_v28 = vld [vmem:[#allocation9 + $0x50] sm:$0xff] }
  0x63   :  { %706 = vmatpush3.msra.mxu0 %v134_v8  ;;  %717 = vmatpush3.msra.mxu1 %v232_v10  ;;  %v324_v27 = vld [vmem:[#allocation9 + $0x58] sm:$0xff]  ;;  %v322_v29 = vld [vmem:[#allocation9 + $0x48] sm:$0xff]  ;;  %v321_v30 = vld [vmem:[#allocation9 + $0x40] sm:$0xff] }
  0x64   :  { %708 = vmatmul.mubr.msk.f32.vlgmr.msra.gmra.mxu0 %vm145_vm1, %v132_v9  ;;  %718 = vmatprep.subr.mxu1 %v1018_v1  ;;  %v320_v31 = vld [vmem:[#allocation9 + $0x38] sm:$0xff]  ;;  %v319_v32 = vld [vmem:[#allocation9 + $0x30] sm:$0xff]  ;;  %v318_v33 = vld [vmem:[#allocation9 + $0x28] sm:$0xff] }
  0x65   :  { %745 = vmatprep.subr.mxu0 %v1018_v1  ;;  %719 = vmatpush3.msra.mxu1 %v231_v11  ;;  %v317_v34 = vld [vmem:[#allocation9 + $0x20] sm:$0xff]  ;;  %v316_v35 = vld [vmem:[#allocation9 + $0x18] sm:$0xff]  ;;  %v315_v36 = vld [vmem:[#allocation9 + $0x10] sm:$0xff] }
  0x66   :  { %777 = vmatprep.mubr.msk.f32.mxu0 %vm1019_vm0, %v1018_v1  ;;  %720 = vmatprep.subr.mxu1 %v1018_v1  ;;  %v632_v37 = vld [vmem:[#allocation6] ss:$0 sm:$0xff]  ;;  %v314_v42 = vld [vmem:[#allocation9 + $0x8] sm:$0xff]  ;;  %v313_v43 = vld [vmem:[#allocation9] sm:$0xff] }
  0x67   :  { %721 = vmatpush3.msra.mxu1 %v230_v12  ;;  %746 = vmatpush3.msra.mxu0 %v328_v23  ;;  %v634_v44 = vld [vmem:[#allocation8] ss:$0 sm:$0xff]  ;;  %v635_v48 = vld [vmem:[#allocation11] ss:$0 sm:$0xff]  ;;  %v636_v52 = vld [vmem:[#allocation12] ss:$0 sm:$0xff] }
  0x68   :  { %722 = vmatprep.subr.mxu1 %v1018_v1  ;;  %747 = vmatprep.subr.mxu0 %v1018_v1  ;;  %v459_v56 = vld [vmem:[%s1301_s10 + $0x78] sm:$0xff]  ;;  %v458_v57 = vld [vmem:[%s1301_s10 + $0x70] sm:$0xff]  ;;  %v457_v58 = vld [vmem:[%s1301_s10 + $0x68] sm:$0xff] }
  0x69   :  { %723 = vmatpush3.msra.mxu1 %v229_v13  ;;  %748 = vmatpush3.msra.mxu0 %v327_v24  ;;  %v456_v59 = vld [vmem:[%s1301_s10 + $0x60] sm:$0xff]  ;;  %v455_v60 = vld [vmem:[%s1301_s10 + $0x58] sm:$0xff]  ;;  %v454_v61 = vld [vmem:[%s1301_s10 + $0x50] sm:$0xff] }
  0x6a   :  { %724 = vmatprep.subr.mxu1 %v1018_v1  ;;  %749 = vmatprep.subr.mxu0 %v1018_v1  ;;  %v453_v62 = vld [vmem:[%s1301_s10 + $0x48] sm:$0xff]  ;;  %v452_v63 = vld [vmem:[%s1301_s10 + $0x40] sm:$0xff]  ;;  %v451_v0 = vld [vmem:[%s1301_s10 + $0x38] sm:$0xff] }
  0x6b   :  { %725 = vmatpush3.msra.mxu1 %v228_v14  ;;  %750 = vmatpush3.msra.mxu0 %v326_v25  ;;  %v450_v2 = vld [vmem:[%s1301_s10 + $0x30] sm:$0xff]  ;;  %v449_v3 = vld [vmem:[%s1301_s10 + $0x28] sm:$0xff]  ;;  %v448_v4 = vld [vmem:[%s1301_s10 + $0x20] sm:$0xff] }
  0x6c   :  { %726 = vmatprep.subr.mxu1 %v1018_v1  ;;  %751 = vmatprep.subr.mxu0 %v1018_v1  ;;  %v447_v5 = vld [vmem:[%s1301_s10 + $0x18] sm:$0xff]  ;;  %v446_v6 = vld [vmem:[%s1301_s10 + $0x10] sm:$0xff]  ;;  %v445_v7 = vld [vmem:[%s1301_s10 + $0x8] sm:$0xff] }
  0x6d   :  { %727 = vmatpush3.msra.mxu1 %v227_v15  ;;  %752 = vmatpush3.msra.mxu0 %v325_v26  ;;  %v637_v8 = vld [vmem:[#allocation2] ss:$0 sm:$0xff]  ;;  %v460_v14 = vld [vmem:[#allocation14] sm:$0xff] }
  0x6e   :  { %728 = vmatprep.subr.mxu1 %v1018_v1  ;;  %753 = vmatprep.subr.mxu0 %v1018_v1  ;;  %v444_v15 = vld [vmem:[%s1301_s10] sm:$0xff] }
  0x6f   :  { %729 = vmatpush3.msra.mxu1 %v226_v16  ;;  %754 = vmatpush3.msra.mxu0 %v324_v27  ;;  %v640_v24 = vld [vmem:[%s1303_s12] ss:$0 sm:$0xff] }
  0x70   :  { %730 = vmatprep.subr.mxu1 %v1018_v1  ;;  %755 = vmatprep.subr.mxu0 %v1018_v1 }
  0x71   :  { %731 = vmatpush3.msra.mxu1 %v225_v17  ;;  %756 = vmatpush3.msra.mxu0 %v323_v28 }
  0x72   :  { %732 = vmatprep.subr.mxu1 %v1018_v1  ;;  %757 = vmatprep.subr.mxu0 %v1018_v1 }
  0x73   :  { %733 = vmatpush3.msra.mxu1 %v224_v18  ;;  %758 = vmatpush3.msra.mxu0 %v322_v29  ;;  %v133_v18 = vld [vmem:[%s1292_s1] sm:$0xff]  ;;  %s979_s1 = scalar_lea.vmem %s621_s19, 128 }
  0x74   :  { %734 = vmatprep.subr.mxu1 %v1018_v1  ;;  %759 = vmatprep.subr.mxu0 %v1018_v1  ;;  %p980_p7 = scmp.ne.s32.totalorder %s621_s19, %s979_s1  ;;  %p985_p9 = scmp.lt.s32.totalorder %s979_s1, %s979_s1 }
  0x75   :  { %735 = vmatpush3.msra.mxu1 %v223_v19  ;;  %760 = vmatpush3.msra.mxu0 %v321_v30 }
  0x76   :  { %736 = vmatprep.subr.mxu1 %v1018_v1  ;;  %761 = vmatprep.subr.mxu0 %v1018_v1  ;;  %p986_p10 = por %p985_p9, %p984_p8 }
  0x77   :  { %737 = vmatpush3.msra.mxu1 %v222_v20  ;;  %762 = vmatpush3.msra.mxu0 %v320_v31 }
  0x78   :  { %738 = vmatprep.subr.mxu1 %v1018_v1  ;;  %763 = vmatprep.subr.mxu0 %v1018_v1  ;;  %p987_p11 = pnand %p986_p10, %p980_p7 }
  0x79   :  { %739 = vmatpush3.msra.mxu1 %v221_v21  ;;  %764 = vmatpush3.msra.mxu0 %v319_v32 }
  0x7a   :  { %740 = vmatprep.subr.mxu1 %v1018_v1  ;;  %765 = vmatprep.subr.mxu0 %v1018_v1 }
  0x7b   :  { %741 = vmatpush3.msra.mxu1 %v220_v22  ;;  %766 = vmatpush3.msra.mxu0 %v318_v33 }
  0x7c   :  { %785 = vmatprep.subr.mxu1 %v1018_v1  ;;  %767 = vmatprep.subr.mxu0 %v1018_v1 }
  0x7d   :  { %768 = vmatpush3.msra.mxu0 %v317_v34  ;;  %833 = vset.pattern.permute.xlu0 %v1020_v55 }
  0x7e   :  { %769 = vmatprep.subr.mxu0 %v1018_v1  ;;  %834 = vset.pattern.permute.xlu1 %v1020_v55 }
  0x7f   :  { %770 = vmatpush3.msra.mxu0 %v316_v35 }
  0x80   :  { %771 = vmatprep.subr.mxu0 %v1018_v1 }
  0x81   :  { %772 = vmatpush3.msra.mxu0 %v315_v36 }
  0x82   :  { %773 = vmatprep.subr.mxu0 %v1018_v1 }
  0x83   :  { %774 = vmatpush3.msra.mxu0 %v314_v42 }
  0x84   :  { %775 = vmatprep.subr.mxu0 %v1018_v1 }
  0x85   :  { %776 = vmatpush3.msra.mxu0 %v313_v43 }
  0x86   :  { %780 = vmatprep.subr.mxu0 %v1018_v1 }
 0x124   :  { %v215_v38 = vpop.f32.mrf.mxu0 }
 0x125   :  { %v216_v39 = vadd.f32 %v632_v37, %v215_v38 }
 0x126   :  { %v709_v40 = vpop.f32.mrf.mxu0 }
 0x127   :  { %v219_v41 = vmax.f32 %v216_v39, 0.0 }
 0x129   :  { %743 = vmatmul.mubr.f32.vlgmr.msra.gmra.mxu1 %v219_v41 }
 0x12a   :  { %817 = vmatprep.mubr.msk.f32.mxu1 %vm1019_vm0, %v1018_v1  ;;  %786 = vmatpush3.msra.mxu1 %v459_v56 }
 0x12b   :  { %787 = vmatprep.subr.mxu1 %v1018_v1 }
 0x12c   :  { %788 = vmatpush3.msra.mxu1 %v458_v57 }
 0x12d   :  { %789 = vmatprep.subr.mxu1 %v1018_v1 }
 0x12e   :  { %790 = vmatpush3.msra.mxu1 %v457_v58 }
 0x12f   :  { %791 = vmatprep.subr.mxu1 %v1018_v1 }
 0x130   :  { %792 = vmatpush3.msra.mxu1 %v456_v59 }
 0x131   :  { %793 = vmatprep.subr.mxu1 %v1018_v1 }
 0x132   :  { %794 = vmatpush3.msra.mxu1 %v455_v60 }
 0x133   :  { %795 = vmatprep.subr.mxu1 %v1018_v1 }
 0x134   :  { %796 = vmatpush3.msra.mxu1 %v454_v61 }
 0x135   :  { %797 = vmatprep.subr.mxu1 %v1018_v1 }
 0x136   :  { %798 = vmatpush3.msra.mxu1 %v453_v62 }
 0x137   :  { %799 = vmatprep.subr.mxu1 %v1018_v1 }
 0x138   :  { %800 = vmatpush3.msra.mxu1 %v452_v63 }
 0x139   :  { %801 = vmatprep.subr.mxu1 %v1018_v1 }
 0x13a   :  { %802 = vmatpush3.msra.mxu1 %v451_v0 }
 0x13b   :  { %803 = vmatprep.subr.mxu1 %v1018_v1 }
 0x13c   :  { %804 = vmatpush3.msra.mxu1 %v450_v2 }
 0x13d   :  { %805 = vmatprep.subr.mxu1 %v1018_v1 }
 0x13e   :  { %806 = vmatpush3.msra.mxu1 %v449_v3 }
 0x13f   :  { %807 = vmatprep.subr.mxu1 %v1018_v1 }
 0x140   :  { %808 = vmatpush3.msra.mxu1 %v448_v4 }
 0x141   :  { %809 = vmatprep.subr.mxu1 %v1018_v1 }
 0x142   :  { %810 = vmatpush3.msra.mxu1 %v447_v5 }
 0x143   :  { %811 = vmatprep.subr.mxu1 %v1018_v1 }
 0x144   :  { %812 = vmatpush3.msra.mxu1 %v446_v6 }
 0x145   :  { %813 = vmatprep.subr.mxu1 %v1018_v1 }
 0x146   :  { %814 = vmatpush3.msra.mxu1 %v445_v7 }
 0x147   :  { %815 = vmatprep.subr.mxu1 %v1018_v1 }
 0x148   :  { %816 = vmatpush3.msra.mxu1 %v444_v15 }
 0x1e9   :  { %v309_v45 = vpop.f32.mrf.mxu1 }
 0x1ea   :  { %v1213_v46 = vadd.f32 %v634_v44, %v309_v45 }
 0x1eb   :  { %v744_v47 = vpop.f32.mrf.mxu1 }
 0x1ec   :  { %778 = vmatmul.mubr.f32.vlgmr.msra.gmra.mxu0 %v1213_v46 }
 0x1ed   :  { %782 = vmatprep.mubr.msk.f32.mxu0 %vm1019_vm0, %v1018_v1  ;;  %781 = vmatpush3.msra.mxu0 %v460_v14 }
 0x2ac   :  { %v402_v49 = vpop.f32.mrf.mxu0 }
 0x2ad   :  { %v403_v50 = vadd.f32 %v635_v48, %v402_v49 }
 0x2ae   :  { %v779_v51 = vpop.f32.mrf.mxu0 }
 0x2af   :  { %v406_v53 = vmax.f32 %v403_v50, 0.0 }
 0x2b1   :  { %v414_v54 = vmul.f32 %v636_v52, %v406_v53 }
 0x2b3   :  { %415 = vadd.xlane.f32.xlu0 %v414_v54 }
 0x33c   :  { %v416_v9 = vpop.xlane.xlu0 %415 }
 0x33d   :  { %v424_v10 = vadd.f32 %v637_v8, %v416_v9 }
 0x33f   :  { %v638_v11 = vmul.f32 -1.442695, %v424_v10 }
 0x341   :  { %835 = vpow2.f32 %v638_v11 }
 0x34e   :  { %v836_v12 = vpop.eup %835 }
 0x34f   :  { %v428_v13 = vadd.f32 1.0, %v836_v12 }
 0x351   :  { %837 = vrcp.f32 %v428_v13 }
 0x35e   :  { %v838_v16 = vpop.eup %837 }
 0x35f   :  { %433 = vperm.xlu0 %833, %v838_v16   ;;  %v437_v17 = vsub.f32 1.0, %v838_v16 }
 0x361   :  { %440 = vperm.xlu1 %834, %v437_v17  }
 0x3da   :  { %v434_v1 = vpop.permute.xlu0 %433 }
 0x3db   :  { %v436_v19 = vmul.f32 %v434_v1, %v1213_v46 }
 0x3dc   :  { %v441_v20 = vpop.permute.xlu1 %440 }
 0x3dd   :  { %v443_v21 = vmul.f32 %v441_v20, %v133_v18  ;;  %818 = vmatmul.mubr.f32.vlgmr.msra.gmra.mxu1 %v436_v19 }
 0x3df   :  { %783 = vmatmul.mubr.msk.f32.vlgmr.msra.gmra.mxu0 %vm461_vm2, %v443_v21 }
 0x49d   :  { %v601_v22 = vpop.f32.mrf.mxu1 }
 0x49f   :  { %v531_v23 = vpop.f32.mrf.mxu0  ;;  %v819_v25 = vpop.f32.mrf.mxu1 }
 0x4a0   :  { %v602_v26 = vadd.f32 %v601_v22, %v531_v23 }
 0x4a1   :  { %v784_v27 = vpop.f32.mrf.mxu0 }
 0x4a2   :  { %v612_v28 = vadd.f32 %v640_v24, %v602_v26 }
 0x4a4   :  { %613 = vst.msk [vmem:[#allocation15] sm:$0xff] %vm461_vm2, %v612_v28 }
 0x4a5   :  { %990 = shalt.err (!%p987_p11)
}
 0x4a6   :  { %623 = dma.vmem_to_hbm [thread:$0]  %s621_s19, 128, %s1304_s13, [#allocation5]  }
 0x4a7   :  { %1007 = dma.done.wait [#allocation5], 128  }
 0x4a8   :  { %1008 = vsyncadd [#allocation5], 4294967168 }
 0x4a9   :  { %627 = vsyncpa [#allocation4], 1 }
 0x4aa   :  { %628 = vsyncpa [#allocation7], 1 }
 0x4ab   :  { %629 = vsyncpa [#allocation10], 1 }
 0x4ac   :  { %630 = vsyncpa [#allocation13], 1 }
 0x4ad   :  { %631 = vsyncpa [#allocation5], 1 }

</bundles_post_ra>
